<compile_context>
chip_gen: v5e
topology: v5e:2x2
jax: 0.10.0
libtpu: 0.0.40
codegen_flags: <defaults>
</compile_context>

<pallas_src>
from functools import partial

import jax
import jax.numpy as jnp
from jax.experimental import pallas as pl
from jax.experimental.pallas import tpu as pltpu

_MiB = 1024 * 1024


# ---------------------------------------------------------------------------
# Path 1: zero-copy identity via buffer donation + input/output aliasing.
# ---------------------------------------------------------------------------
def _identity_alias_kernel(x_ref, o_ref, flag_ref):
    # Output buffer aliases the input buffer (input_output_aliases={0: 0}), so
    # there is no data to move. Both refs live in pl.ANY (HBM) and are left
    # untouched. A single SMEM scalar store keeps the Mosaic body non-empty.
    del x_ref, o_ref
    flag_ref[0] = jnp.int32(1)


@partial(jax.jit, donate_argnums=0)
def identity(x: jax.Array) -> jax.Array:
    """Identity forward: output aliases the (donated) input buffer. No HBM copy."""
    if x.size == 0:
        return x
    return pl.pallas_call(
        _identity_alias_kernel,
        out_shape=jax.ShapeDtypeStruct(x.shape, x.dtype),
        in_specs=[pl.BlockSpec(memory_space=pl.ANY)],   # leave input in HBM, no DMA
        out_specs=pl.BlockSpec(memory_space=pl.ANY),    # output = same HBM buffer
        scratch_shapes=[pltpu.SMEM((1,), jnp.int32)],
        input_output_aliases={0: 0},
        cost_estimate=pl.CostEstimate(flops=0, transcendentals=0, bytes_accessed=0),
    )(x)


# ---------------------------------------------------------------------------
# Path 2: materialized copy, tiled + lane-dense, generation-keyed VMEM budgets.
# ---------------------------------------------------------------------------
def _copy_kernel(x_ref, o_ref):
    o_ref[...] = x_ref[...]


def _generation_budgets():
    """(per-tile byte budget, scoped vmem_limit_bytes) keyed off the TPU generation."""
    vmem_cap = None
    try:
        vmem_cap = int(pltpu.get_tpu_info().vmem_capacity_bytes)
    except Exception:
        vmem_cap = None
    try:
        kind = jax.devices()[0].device_kind.lower()
    except Exception:
        kind = ""
    if "v5" in kind:
        # ~820 GB/s HBM: 4 MiB tiles already hide the ~0.35 us step overhead.
        tile, limit = 4 * _MiB, 32 * _MiB
    elif "v6" in kind:
        # 128 MiB physical VMEM, 1.4 TB/s HBM: bigger tiles cut grid-step count.
        tile, limit = 12 * _MiB, 64 * _MiB
    else:
        # v7x (64 MiB physical VMEM, 3.2 TB/s HBM) and unknown/newer: headroom under 64 MiB.
        tile, limit = 8 * _MiB, 48 * _MiB
    if vmem_cap:
        limit = min(limit, (vmem_cap * 3) // 4)
        tile = min(tile, max(limit // 4, _MiB))   # 2 in/out x double-buffer = 4x tile
    return tile, limit


def _lane_dense_2d(shape):
    """Pick a lane-dense (rows, cols) factorization of the flattened size."""
    total = 1
    for d in shape:
        total *= int(d)
    if total == 0:
        return 0, 128
    if total % 128 == 0:
        # Wide multiple-of-128 lane axis => unmasked `vst`; keep rows >= 8 when
        # possible so the row axis can still be split across grid steps.
        cols = 128
        for cand in (4096, 2048, 1024, 512, 384, 256, 128):
            if total % cand == 0 and (total // cand >= 8 or total <= cand):
                cols = cand
                break
        return total // cols, cols
    # Element count not a multiple of 128: keep a trailing dim >= 128 if one exists.
    last = int(shape[-1]) if shape else 1
    if last >= 128 and total % last == 0:
        return total // last, last
    # TODO(synk): pad-to-128 + masked tail block would avoid vst.msk partial stores here.
    return 1, total


def _pick_row_block(rows, cols, itemsize, tile_budget):
    """Row block: VMEM-budgeted, dtype-aware sublane aligned, >=2 steps, divisor-preferring."""
    itemsize = max(int(itemsize), 1)
    align = 8 * max(4 // itemsize, 1)           # 8 f32/i32, 16 bf16, 32 int8/fp8
    bytes_per_row = max(cols * itemsize, 1)
    total_bytes = rows * bytes_per_row

    rb = max(tile_budget // bytes_per_row, 1)   # VMEM budget cap
    # Guarantee >=2 (target 4) grid steps on non-trivial arrays so both v7x
    # TensorCores participate and DMA prefetch/writeback overlaps compute.
    if total_bytes > 2 * _MiB and rows >= 2 * align:
        rb = min(rb, max((rows + 3) // 4, align))
    if rb >= rows:
        return rows                             # whole array fits one (small) block

    # Align to the packed-sublane multiple, then prefer the largest aligned
    # divisor of rows so the final grid step isn't a masked partial tile.
    rb = max((rb // align) * align, align)
    r = min(rb, (rows // align) * align)
    while r >= align:
        if rows % r == 0:
            return r
        r -= align
    return min(rb, rows)


@jax.jit
def identity_copy(x: jax.Array) -> jax.Array:
    """Identity that materializes an independent copy via a pipelined Pallas copy."""
    if x.size == 0:
        return x
    orig_shape = x.shape
    rows, cols = _lane_dense_2d(orig_shape)
    x2 = x.reshape(rows, cols)

    tile_budget, vmem_limit = _generation_budgets()
    rb = _pick_row_block(rows, cols, x.dtype.itemsize, tile_budget)
    grid = ((rows + rb - 1) // rb,)

    out2 = pl.pallas_call(
        _copy_kernel,
        out_shape=jax.ShapeDtypeStruct((rows, cols), x.dtype),
        grid_spec=pl.GridSpec(
            grid=grid,
            in_specs=[pl.BlockSpec((rb, cols), lambda i: (i, 0))],
            out_specs=pl.BlockSpec((rb, cols), lambda i: (i, 0)),
        ),
        compiler_params=pltpu.CompilerParams(
            dimension_semantics=("parallel",),     # shards grid across TCs on v7x
            vmem_limit_bytes=vmem_limit,           # generation-keyed scoped VMEM
        ),
        cost_estimate=pl.CostEstimate(
            flops=0,
            transcendentals=0,
            bytes_accessed=2 * x.size * x.dtype.itemsize,
        ),
    )(x2)
    return out2.reshape(orig_shape)


if __name__ == "__main__":
    key = jax.random.PRNGKey(0)
    x = jax.random.normal(key, (2, 4, 16, 16), dtype=jnp.float32)
    x_ref = jax.device_get(x)           # host reference, independent of device buffer

    # Materialized-copy path first (does not donate x).
    y2 = jax.block_until_ready(identity_copy(x))
    assert y2.shape == x_ref.shape and y2.dtype == jnp.float32
    assert bool(jnp.array_equal(y2, jnp.asarray(x_ref)))

    # Extra copy-path check: bf16, rows>1 lane-dense slab.
    xb = jax.random.normal(jax.random.PRNGKey(0), (16, 384), dtype=jnp.float32).astype(jnp.bfloat16)
    xb_ref = jax.device_get(xb)
    yb = jax.block_until_ready(identity_copy(xb))
    assert yb.shape == xb_ref.shape and yb.dtype == jnp.bfloat16
    assert bool(jnp.array_equal(yb, jnp.asarray(xb_ref)))

    # Zero-copy (donated + aliased) path; x must not be reused after this call.
    y = jax.block_until_ready(identity(x))
    assert y.shape == x_ref.shape and y.dtype == jnp.float32
    assert bool(jnp.array_equal(y, jnp.asarray(x_ref)))

    print("KERNEL_OK")
</pallas_src>

<mosaic_0001>
module attributes {stable_mosaic.version = 11 : i64} {
  func.func @_copy_kernel(%arg0: i32, %arg1: memref<1x2048xf32, #tpu.memory_space<vmem>>, %arg2: memref<1x2048xf32, #tpu.memory_space<vmem>>) attributes {dimension_semantics = [#tpu.dimension_semantics<parallel>], iteration_bounds = array<i64: 1>, scalar_prefetch = 0 : i64, scratch_operands = 0 : i64, tpu.core_type = #tpu.core_type<tc>, window_params = [{transform_indices = @transform_0, window_bounds = array<i64: 1, 2048>}, {transform_indices = @transform_1, window_bounds = array<i64: 1, 2048>}]} {
    %c0 = arith.constant 0 : index
    %c0_0 = arith.constant 0 : index
    %0 = vector.load %arg1[%c0, %c0_0] : memref<1x2048xf32, #tpu.memory_space<vmem>>, vector<1x2048xf32>
    %c0_1 = arith.constant 0 : index
    %c0_2 = arith.constant 0 : index
    %1 = vector.load %arg2[%c0_1, %c0_2] : memref<1x2048xf32, #tpu.memory_space<vmem>>, vector<1x2048xf32>
    tpu.vector_store %arg2[%c0_1, %c0_2], %0 {strides = array<i32>} : memref<1x2048xf32, #tpu.memory_space<vmem>>, vector<1x2048xf32>,
    return
  }
  func.func @transform_0(%arg0: i32) -> (i32, i32) {
    %c0_i32 = arith.constant 0 : i32
    %c0_i32_0 = arith.constant 0 : i32
    return %arg0, %c0_i32 : i32, i32
  }
  func.func @transform_1(%arg0: i32) -> (i32, i32) {
    %c0_i32 = arith.constant 0 : i32
    %c0_i32_0 = arith.constant 0 : i32
    return %arg0, %c0_i32 : i32, i32
  }
}

</mosaic_0001>

<bundles_post_ra>
// kernel: identity_copy.1
= control target key start
LH: loop header
LB: loop body
LE: loop exit
PB: predicated region body
PF: predicated region fallthrough
CT: control target
= control target key end

     0   :  { %s38_s0 = inlined_call_operand.vmem [shape: f32[1,2048], index: 0, kind: input, shape index: {}]   ;;  %s39_s1 = inlined_call_operand.vmem [shape: f32[1,2048], index: 1, kind: output, shape index: {}]  }
   0x1   :  { %v8_v0 = vld [vmem:[%s38_s0] sm:$0xff]  ;;  %v9_v1 = vld [vmem:[%s38_s0 + $0x8] sm:$0xff] }
   0x2   :  { %10 = vst [vmem:[%s39_s1] sm:$0xff] %v8_v0 }
   0x3   :  { %11 = vst [vmem:[%s39_s1 + $0x8] sm:$0xff] %v9_v1 }

</bundles_post_ra>
